<compile_context>
chip_gen: v7x
topology: tpu7x:2x2x1
jax: 0.10.0
libtpu: 0.0.40
codegen_flags: <defaults>
</compile_context>

<pallas_src>
import functools
import math

import jax
import jax.numpy as jnp
from jax.experimental import pallas as pl
from jax.experimental.pallas import tpu as pltpu


def _round_up(x, m):
    return ((x + m - 1) // m) * m


def _apply_act(h, act, slope):
    if act == "lrelu":
        return jnp.where(h >= 0, h, slope * h)
    elif act == "xtanh":
        return jnp.tanh(h) + slope * h
    elif act == "sigmoid":
        return jax.nn.sigmoid(h)
    elif act == "none":
        return h
    else:
        raise ValueError(f"Incorrect activation: {act}")


def _fused_mlp_kernel(*refs, n_layers, acts, slope):
    # refs = (x_ref, w0_ref, b0_ref, ..., w{L-1}_ref, b{L-1}_ref, o_ref)
    x_ref = refs[0]
    o_ref = refs[-1]
    h = x_ref[...].astype(jnp.float32)
    for c in range(n_layers):                      # static Python loop (unrolled at trace time)
        w = refs[1 + 2 * c][...]
        b = refs[2 + 2 * c][...]
        h = jnp.dot(h, w, preferred_element_type=jnp.float32) + b
        if c < n_layers - 1:
            h = _apply_act(h, acts[c], slope)
    o_ref[...] = h.astype(o_ref.dtype)


def fused_mlp(x_pad, params_pad, acts, slope, tm):
    """Single pallas_call running the whole padded MLP. x_pad: (B_pad, D_in_pad)."""
    B_pad, D_in = x_pad.shape
    n_layers = len(params_pad)
    D_out = params_pad[-1][0].shape[1]
    assert B_pad % tm == 0

    in_specs = [pl.BlockSpec((tm, D_in), lambda i: (i, 0))]
    flat_args = [x_pad]
    for (w, b) in params_pad:
        # Weights/biases: full-array blocks, same block index every grid step
        # -> they stay VMEM-resident, DMA'd once.
        in_specs.append(pl.BlockSpec(w.shape, lambda i: (0, 0)))
        in_specs.append(pl.BlockSpec(b.shape, lambda i: (0, 0)))
        flat_args += [w, b]

    kernel = functools.partial(
        _fused_mlp_kernel, n_layers=n_layers, acts=tuple(acts), slope=slope)

    return pl.pallas_call(
        kernel,
        out_shape=jax.ShapeDtypeStruct((B_pad, D_out), x_pad.dtype),
        grid_spec=pltpu.PrefetchScalarGridSpec(
            num_scalar_prefetch=0,
            grid=(B_pad // tm,),
            in_specs=in_specs,
            out_specs=pl.BlockSpec((tm, D_out), lambda i: (i, 0)),
        ),
        compiler_params=pltpu.CompilerParams(
            dimension_semantics=("parallel",)),
    )(*flat_args)


class MLP:
    """JAX/Pallas port of the PyTorch MLP forward pass (fused single-kernel)."""

    def __init__(self, input_dim, output_dim, hidden_dim, n_layers,
                 activation="none", slope=0.1, key=None):
        self.input_dim = input_dim
        self.output_dim = output_dim
        self.n_layers = n_layers
        self.slope = slope

        if isinstance(hidden_dim, (int, float)):
            self.hidden_dim = [int(hidden_dim)] * (n_layers - 1)
        elif isinstance(hidden_dim, list):
            self.hidden_dim = hidden_dim
        else:
            raise ValueError(f"Wrong argument type for hidden_dim: {hidden_dim}")

        if isinstance(activation, str):
            self.activation = [activation] * (n_layers - 1)
        elif isinstance(activation, list):
            self.activation = activation
        else:
            raise ValueError(f"Wrong argument type for activation: {activation}")

        # Layer dimensions (same construction as the PyTorch module).
        if n_layers == 1:
            dims = [(input_dim, output_dim)]
        else:
            dims = [(input_dim, self.hidden_dim[0])]
            for i in range(1, n_layers - 1):
                dims.append((self.hidden_dim[i - 1], self.hidden_dim[i]))
            dims.append((self.hidden_dim[n_layers - 2], output_dim))
        self._dims = dims

        # Deterministic init (mirrors nn.Linear's U(-1/sqrt(fan_in), +1/sqrt(fan_in))).
        if key is None:
            key = jax.random.PRNGKey(0)
        self.params = []       # unpadded (for the pure-JAX reference)
        self.params_pad = []   # lane-dense, kernel-ready: W (in_pad, out_pad), b (1, out_pad)
        for (d_in, d_out) in dims:
            key, kw, kb = jax.random.split(key, 3)
            bound = 1.0 / math.sqrt(d_in)
            w = jax.random.uniform(kw, (d_in, d_out), jnp.float32, -bound, bound)
            b = jax.random.uniform(kb, (d_out,), jnp.float32, -bound, bound)
            self.params.append((w, b))

            d_in_p = _round_up(d_in, 128)
            d_out_p = _round_up(d_out, 128)
            w_pad = jnp.zeros((d_in_p, d_out_p), jnp.float32).at[:d_in, :d_out].set(w)
            b_pad = jnp.zeros((1, d_out_p), jnp.float32).at[0, :d_out].set(b)
            self.params_pad.append((w_pad, b_pad))

        self._d_in_pad = _round_up(input_dim, 128)
        self._d_out_pad = _round_up(output_dim, 128)

    def __call__(self, x):
        B = x.shape[0]
        # Batch tile: 256-row tiles for large B (MXU-friendly, big enough to amortize
        # the ~0.35 us/step overhead), otherwise one sublane-rounded tile (single step).
        tm = 256 if B >= 256 else _round_up(B, 8)
        B_pad = _round_up(B, tm)

        x_pad = jnp.zeros((B_pad, self._d_in_pad), x.dtype)
        x_pad = x_pad.at[:B, :self.input_dim].set(x)

        acts = self.activation if self.n_layers > 1 else []
        out_pad = fused_mlp(x_pad, self.params_pad, acts, self.slope, tm)
        return out_pad[:B, :self.output_dim]

    # Pure-JAX reference for correctness checking.
    def reference(self, x):
        h = x
        for c in range(self.n_layers):
            w, b = self.params[c]
            h = h @ w + b
            if c != self.n_layers - 1:
                h = _apply_act(h, self.activation[c], self.slope)
        return h


if __name__ == "__main__":
    key = jax.random.PRNGKey(0)
    k_x, k_p = jax.random.split(key)

    batch, input_dim, hidden_dim, output_dim, n_layers = 8, 16, 32, 8, 3
    x = jax.random.normal(k_x, (batch, input_dim), jnp.float32)

    # Mixed activation list exercises lrelu and the sigmoid(0)=0.5 padding path.
    mlp = MLP(input_dim, output_dim, hidden_dim, n_layers,
              activation=["lrelu", "sigmoid"], slope=0.1, key=k_p)

    out = mlp(x)
    out = jax.block_until_ready(out)

    ref = mlp.reference(x)
    assert out.shape == (batch, output_dim)
    assert jnp.allclose(out, ref, atol=1e-5, rtol=1e-5), "mismatch vs reference"

    print("KERNEL_OK")
</pallas_src>

<mosaic_0001>
module attributes {stable_mosaic.version = 11 : i64} {
  func.func @_fused_mlp_kernel(%arg0: i32, %arg1: memref<8x128xf32, #tpu.memory_space<vmem>>, %arg2: memref<128x128xf32, #tpu.memory_space<vmem>>, %arg3: memref<1x128xf32, #tpu.memory_space<vmem>>, %arg4: memref<128x128xf32, #tpu.memory_space<vmem>>, %arg5: memref<1x128xf32, #tpu.memory_space<vmem>>, %arg6: memref<128x128xf32, #tpu.memory_space<vmem>>, %arg7: memref<1x128xf32, #tpu.memory_space<vmem>>, %arg8: memref<8x128xf32, #tpu.memory_space<vmem>>) attributes {dimension_semantics = [#tpu.dimension_semantics<parallel>], iteration_bounds = array<i64: 1>, scalar_prefetch = 0 : i64, scratch_operands = 0 : i64, tpu.core_type = #tpu.core_type<tc>, window_params = [{transform_indices = @transform_0, window_bounds = array<i64: 8, 128>}, {pipeline_mode = #tpu.pipeline_mode<synchronous>, transform_indices = @transform_1, window_bounds = array<i64: 128, 128>}, {pipeline_mode = #tpu.pipeline_mode<synchronous>, transform_indices = @transform_2, window_bounds = array<i64: 1, 128>}, {pipeline_mode = #tpu.pipeline_mode<synchronous>, transform_indices = @transform_3, window_bounds = array<i64: 128, 128>}, {pipeline_mode = #tpu.pipeline_mode<synchronous>, transform_indices = @transform_4, window_bounds = array<i64: 1, 128>}, {pipeline_mode = #tpu.pipeline_mode<synchronous>, transform_indices = @transform_5, window_bounds = array<i64: 128, 128>}, {pipeline_mode = #tpu.pipeline_mode<synchronous>, transform_indices = @transform_6, window_bounds = array<i64: 1, 128>}, {transform_indices = @transform_7, window_bounds = array<i64: 8, 128>}]} {
    %c0 = arith.constant 0 : index
    %c0_0 = arith.constant 0 : index
    %0 = vector.load %arg1[%c0, %c0_0] : memref<8x128xf32, #tpu.memory_space<vmem>>, vector<8x128xf32>
    %c0_1 = arith.constant 0 : index
    %c0_2 = arith.constant 0 : index
    %1 = vector.load %arg2[%c0_1, %c0_2] : memref<128x128xf32, #tpu.memory_space<vmem>>, vector<128x128xf32>
    %c0_3 = arith.constant 0 : index
    %c0_4 = arith.constant 0 : index
    %2 = vector.load %arg3[%c0_3, %c0_4] : memref<1x128xf32, #tpu.memory_space<vmem>>, vector<1x128xf32>
    %cst = arith.constant dense<0.000000e+00> : vector<8x128xf32>
    %3 = tpu.matmul %0, %1, %cst {dimension_numbers = #tpu.dot_dimension_numbers<[1], [0], [0], [1], [0, 0, 1, 1], [], []>} : vector<8x128xf32>, vector<128x128xf32>, vector<8x128xf32> -> vector<8x128xf32>
    %4 = vector.broadcast %2 : vector<1x128xf32> to vector<8x128xf32>
    %5 = arith.addf %3, %4 : vector<8x128xf32>
    %cst_5 = arith.constant 0.000000e+00 : f32
    %6 = vector.broadcast %cst_5 : f32 to vector<8x128xf32>
    %7 = arith.cmpf oge, %5, %6 : vector<8x128xf32>
    %cst_6 = arith.constant 1.000000e-01 : f32
    %8 = vector.broadcast %cst_6 : f32 to vector<8x128xf32>
    %9 = arith.mulf %8, %5 : vector<8x128xf32>
    %10 = arith.select %7, %5, %9 : vector<8x128xi1>, vector<8x128xf32>
    %c0_7 = arith.constant 0 : index
    %c0_8 = arith.constant 0 : index
    %11 = vector.load %arg4[%c0_7, %c0_8] : memref<128x128xf32, #tpu.memory_space<vmem>>, vector<128x128xf32>
    %c0_9 = arith.constant 0 : index
    %c0_10 = arith.constant 0 : index
    %12 = vector.load %arg5[%c0_9, %c0_10] : memref<1x128xf32, #tpu.memory_space<vmem>>, vector<1x128xf32>
    %cst_11 = arith.constant dense<0.000000e+00> : vector<8x128xf32>
    %13 = tpu.matmul %10, %11, %cst_11 {dimension_numbers = #tpu.dot_dimension_numbers<[1], [0], [0], [1], [0, 0, 1, 1], [], []>} : vector<8x128xf32>, vector<128x128xf32>, vector<8x128xf32> -> vector<8x128xf32>
    %14 = vector.broadcast %12 : vector<1x128xf32> to vector<8x128xf32>
    %15 = arith.addf %13, %14 : vector<8x128xf32>
    %16 = arith.negf %15 : vector<8x128xf32>
    %17 = math.exp %16 : vector<8x128xf32>
    %cst_12 = arith.constant 1.000000e+00 : f32
    %18 = vector.broadcast %cst_12 : f32 to vector<8x128xf32>
    %19 = arith.addf %18, %17 : vector<8x128xf32>
    %20 = arith.divf %18, %19 : vector<8x128xf32>
    %c0_13 = arith.constant 0 : index
    %c0_14 = arith.constant 0 : index
    %21 = vector.load %arg6[%c0_13, %c0_14] : memref<128x128xf32, #tpu.memory_space<vmem>>, vector<128x128xf32>
    %c0_15 = arith.constant 0 : index
    %c0_16 = arith.constant 0 : index
    %22 = vector.load %arg7[%c0_15, %c0_16] : memref<1x128xf32, #tpu.memory_space<vmem>>, vector<1x128xf32>
    %cst_17 = arith.constant dense<0.000000e+00> : vector<8x128xf32>
    %23 = tpu.matmul %20, %21, %cst_17 {dimension_numbers = #tpu.dot_dimension_numbers<[1], [0], [0], [1], [0, 0, 1, 1], [], []>} : vector<8x128xf32>, vector<128x128xf32>, vector<8x128xf32> -> vector<8x128xf32>
    %24 = vector.broadcast %22 : vector<1x128xf32> to vector<8x128xf32>
    %25 = arith.addf %23, %24 : vector<8x128xf32>
    %c0_18 = arith.constant 0 : index
    %c0_19 = arith.constant 0 : index
    %26 = vector.load %arg8[%c0_18, %c0_19] : memref<8x128xf32, #tpu.memory_space<vmem>>, vector<8x128xf32>
    tpu.vector_store %arg8[%c0_18, %c0_19], %25 {strides = array<i32>} : memref<8x128xf32, #tpu.memory_space<vmem>>, vector<8x128xf32>,
    return
  }
  func.func @transform_0(%arg0: i32) -> (i32, i32) {
    %c0_i32 = arith.constant 0 : i32
    %c0_i32_0 = arith.constant 0 : i32
    return %arg0, %c0_i32 : i32, i32
  }
  func.func @transform_1(%arg0: i32) -> (i32, i32) {
    %c0_i32 = arith.constant 0 : i32
    %c0_i32_0 = arith.constant 0 : i32
    %c0_i32_1 = arith.constant 0 : i32
    return %c0_i32, %c0_i32_0 : i32, i32
  }
  func.func @transform_2(%arg0: i32) -> (i32, i32) {
    %c0_i32 = arith.constant 0 : i32
    %c0_i32_0 = arith.constant 0 : i32
    %c0_i32_1 = arith.constant 0 : i32
    return %c0_i32, %c0_i32_0 : i32, i32
  }
  func.func @transform_3(%arg0: i32) -> (i32, i32) {
    %c0_i32 = arith.constant 0 : i32
    %c0_i32_0 = arith.constant 0 : i32
    %c0_i32_1 = arith.constant 0 : i32
    return %c0_i32, %c0_i32_0 : i32, i32
  }
  func.func @transform_4(%arg0: i32) -> (i32, i32) {
    %c0_i32 = arith.constant 0 : i32
    %c0_i32_0 = arith.constant 0 : i32
    %c0_i32_1 = arith.constant 0 : i32
    return %c0_i32, %c0_i32_0 : i32, i32
  }
  func.func @transform_5(%arg0: i32) -> (i32, i32) {
    %c0_i32 = arith.constant 0 : i32
    %c0_i32_0 = arith.constant 0 : i32
    %c0_i32_1 = arith.constant 0 : i32
    return %c0_i32, %c0_i32_0 : i32, i32
  }
  func.func @transform_6(%arg0: i32) -> (i32, i32) {
    %c0_i32 = arith.constant 0 : i32
    %c0_i32_0 = arith.constant 0 : i32
    %c0_i32_1 = arith.constant 0 : i32
    return %c0_i32, %c0_i32_0 : i32, i32
  }
  func.func @transform_7(%arg0: i32) -> (i32, i32) {
    %c0_i32 = arith.constant 0 : i32
    %c0_i32_0 = arith.constant 0 : i32
    return %arg0, %c0_i32 : i32, i32
  }
}

</mosaic_0001>

<bundles_post_ra>
// kernel: tpu_custom_call.1
= control target key start
LH: loop header
LB: loop body
LE: loop exit
PB: predicated region body
PF: predicated region fallthrough
CT: control target
= control target key end

     0   :  { %12 = vsyncpa [#allocation3], 0  ;;  %s909_s0 = inlined_call_operand.hbm [shape: f32[8,128], index: 0, kind: input, shape index: {}]   ;;  %s910_s1 = inlined_call_operand.hbm [shape: f32[128,128], index: 1, kind: input, shape index: {}]   ;;  %s911_s2 = inlined_call_operand.vmem [shape: f32[1,128], index: 2, kind: input, shape index: {}]   ;;  %s912_s3 = inlined_call_operand.hbm [shape: f32[128,128], index: 3, kind: input, shape index: {}]   ;;  %s913_s4 = inlined_call_operand.vmem [shape: f32[1,128], index: 4, kind: input, shape index: {}]   ;;  %s914_s5 = inlined_call_operand.hbm [shape: f32[128,128], index: 5, kind: input, shape index: {}]   ;;  %s915_s6 = inlined_call_operand.vmem [shape: f32[1,128], index: 6, kind: input, shape index: {}]   ;;  %s916_s7 = inlined_call_operand.hbm [shape: f32[8,128], index: 7, kind: output, shape index: {}]  }
   0x1   :  { %13 = vsyncpa [#allocation6], 0 }
   0x2   :  { %14 = vsyncpa [#allocation9], 0 }
   0x3   :  { %15 = vsyncpa [#allocation4], 0  ;;  %s751_s24 = smov [#allocation5]   ;;  %s633_s28 = scalar_lea.hbm %s910_s1, 2048 }
   0x4   :  { %s31_s25 = sshll.u32 %s751_s24, 4  ;;  %p634_p0 = scmp.ne.s32.totalorder %s910_s1, %s633_s28  ;;  %s32_s25 = int_to_ptr.vmem [resolvable:$true] %s31_s25 }
   0x5   :  { %p637_p1 = scmp.lt.u32.totalorder %s633_s28, %s910_s1 }
   0x7   :  { %p639_p2 = pnand %p637_p1, %p634_p0 }
   0x9   :  { %642 = shalt.err (!%p639_p2)
}
   0xa   :  { %s643_s10 = scalar_lea.vmem %s32_s25, 2048  ;;  %p648_p4 = scmp.lt.s32.totalorder %s32_s25, %s32_s25 }
   0xb   :  { %p644_p3 = scmp.ne.s32.totalorder %s32_s25, %s643_s10  ;;  %p649_p5 = scmp.lt.s32.totalorder %s643_s10, %s643_s10 }
   0xd   :  { %p650_p6 = por %p649_p5, %p648_p4 }
   0xf   :  { %p651_p7 = pnand %p650_p6, %p644_p3 }
  0x11   :  { %654 = shalt.err (!%p651_p7)
}
  0x12   :  { %s752_s11 = smov 128   ;;  %s753_s12 = smov 8  }
  0x13   :  { %37 = dma.hbm_to_vmem [thread:$0]  %s910_s1, 2048, %s32_s25, [#allocation6], %s752_s11, %s752_s11, %s753_s12  }
  0x14   :  { %s754_s15 = smov [#allocation2]   ;;  %s755_s17 = smov [#allocation7]  }
  0x15   :  { %s22_s16 = sshll.u32 %s754_s15, 4  ;;  %s45_s18 = sshll.u32 %s755_s17, 4  ;;  %s23_s16 = int_to_ptr.vmem [resolvable:$true] %s22_s16  ;;  %s46_s18 = int_to_ptr.vmem [resolvable:$true] %s45_s18 }
  0x16   :  { %s655_s21 = scalar_lea.hbm %s909_s0, 128 }
  0x17   :  { %p656_p8 = scmp.ne.s32.totalorder %s909_s0, %s655_s21  ;;  %p659_p9 = scmp.lt.u32.totalorder %s655_s21, %s909_s0 }
  0x19   :  { %p661_p10 = pnand %p659_p9, %p656_p8 }
  0x1b   :  { %664 = shalt.err (!%p661_p10)
}
  0x1c   :  { %s665_s1 = scalar_lea.vmem %s23_s16, 128  ;;  %p670_p12 = scmp.lt.s32.totalorder %s23_s16, %s23_s16 }
  0x1d   :  { %p666_p11 = scmp.ne.s32.totalorder %s23_s16, %s665_s1  ;;  %p671_p13 = scmp.lt.s32.totalorder %s665_s1, %s665_s1 }
  0x1f   :  { %p672_p0 = por %p671_p13, %p670_p12 }
  0x21   :  { %p673_p1 = pnand %p672_p0, %p666_p11 }
  0x23   :  { %676 = shalt.err (!%p673_p1)
}
  0x24   :  { %25 = dma.hbm_to_vmem [thread:$0]  %s909_s0, 128, %s23_s16, [#allocation3]  }
  0x25   :  { %s677_s30 = scalar_lea.hbm %s912_s3, 2048 }
  0x26   :  { %p678_p2 = scmp.ne.s32.totalorder %s912_s3, %s677_s30  ;;  %p681_p3 = scmp.lt.u32.totalorder %s677_s30, %s912_s3 }
  0x28   :  { %p683_p4 = pnand %p681_p3, %p678_p2 }
  0x2a   :  { %686 = shalt.err (!%p683_p4)
}
  0x2b   :  { %s687_s14 = scalar_lea.vmem %s46_s18, 2048  ;;  %p692_p6 = scmp.lt.s32.totalorder %s46_s18, %s46_s18 }
  0x2c   :  { %p688_p5 = scmp.ne.s32.totalorder %s46_s18, %s687_s14  ;;  %p693_p7 = scmp.lt.s32.totalorder %s687_s14, %s687_s14 }
  0x2e   :  { %p694_p8 = por %p693_p7, %p692_p6 }
  0x30   :  { %p695_p9 = pnand %p694_p8, %p688_p5 }
  0x32   :  { %698 = shalt.err (!%p695_p9)
}
  0x33   :  { %51 = dma.hbm_to_vmem [thread:$0]  %s912_s3, 2048, %s46_s18, [#allocation6], %s752_s11, %s752_s11, %s753_s12  }
  0x34   :  { %s756_s16 = smov [#allocation8]   ;;  %s699_s21 = scalar_lea.hbm %s914_s5, 2048 }
  0x35   :  { %s59_s17 = sshll.u32 %s756_s16, 4  ;;  %p700_p10 = scmp.ne.s32.totalorder %s914_s5, %s699_s21  ;;  %s60_s17 = int_to_ptr.vmem [resolvable:$true] %s59_s17 }
  0x36   :  { %p703_p11 = scmp.lt.u32.totalorder %s699_s21, %s914_s5 }
  0x38   :  { %p705_p12 = pnand %p703_p11, %p700_p10 }
  0x3a   :  { %708 = shalt.err (!%p705_p12)
}
  0x3b   :  { %s709_s1 = scalar_lea.vmem %s60_s17, 2048  ;;  %p714_p0 = scmp.lt.s32.totalorder %s60_s17, %s60_s17 }
  0x3c   :  { %p710_p13 = scmp.ne.s32.totalorder %s60_s17, %s709_s1  ;;  %p715_p1 = scmp.lt.s32.totalorder %s709_s1, %s709_s1 }
  0x3e   :  { %p716_p2 = por %p715_p1, %p714_p0 }
  0x40   :  { %p717_p3 = pnand %p716_p2, %p710_p13 }
  0x42   :  { %720 = shalt.err (!%p717_p3)
}
  0x43   :  { %65 = dma.hbm_to_vmem [thread:$0]  %s914_s5, 2048, %s60_s17, [#allocation9], %s752_s11, %s752_s11, %s753_s12  }
  0x44   :  { %743 = dma.done.wait [#allocation3], 128  }
  0x45   :  { %744 = vsyncadd [#allocation3], 4294967168 }
  0x46   :  { %745 = dma.done.wait [#allocation6], 4096  }
  0x47   :  { %746 = vsyncadd [#allocation6], 4294963200 }
  0x48   :  { %747 = dma.done.wait [#allocation9], 2048  }
  0x49   :  { %748 = vsyncadd [#allocation9], 4294965248  ;;  %v757_v0 = vmov 0.0|0.0   ;;  %vm758_vm0 = vmmov 0   ;;  %v759_v1 = vmov 0.0   ;;  %v81_v2 = vld [vmem:[#allocation5] sm:$0xff] }
  0x4a   :  { %547 = vmatprep.subr.bf16.mxu0 %v757_v0  ;;  %474 = vmatprep.mubr.msk.f32.mxu0 %vm758_vm0, %v759_v1  ;;  %v82_v3 = vld [vmem:[#allocation5 + $0x8] sm:$0xff]  ;;  %v83_v4 = vld [vmem:[#allocation5 + $0x10] sm:$0xff]  ;;  %v84_v6 = vld [vmem:[#allocation5 + $0x18] sm:$0xff]  ;;  %s760_s28 = smov [#allocation10]  }
  0x4b   :  { %571 = vmatprep.subr.bf16.mxu1 %v757_v0  ;;  %509 = vmatprep.mubr.msk.f32.mxu1 %vm758_vm0, %v759_v1  ;;  %v548_v5 = vpack.c.bf16 %v82_v3, %v81_v2  ;;  %v551_v7 = vpack.c.bf16 %v84_v6, %v83_v4  ;;  %v85_v8 = vld [vmem:[#allocation5 + $0x20] sm:$0xff]  ;;  %v86_v9 = vld [vmem:[#allocation5 + $0x28] sm:$0xff]  ;;  %v179_v12 = vld [vmem:[#allocation7 + $0x10] sm:$0xff]  ;;  %s376_s29 = sshll.u32 %s760_s28, 4  ;;  %s377_s29 = int_to_ptr.vmem [resolvable:$true] %s376_s29 }
  0x4c   :  { %v177_v10 = vld [vmem:[#allocation7] sm:$0xff]  ;;  %v178_v11 = vld [vmem:[#allocation7 + $0x8] sm:$0xff]  ;;  %v180_v13 = vld [vmem:[#allocation7 + $0x18] sm:$0xff]  ;;  %v554_v14 = vpack.c.bf16 %v86_v9, %v85_v8  ;;  %p726_p5 = scmp.lt.s32.totalorder %s377_s29, %s377_s29 }
  0x4d   :  { %549 = vmatpush3.bf16.msra.mxu0 %v548_v5  ;;  %v572_v15 = vpack.c.bf16 %v178_v11, %v177_v10  ;;  %v87_v16 = vld [vmem:[#allocation5 + $0x30] sm:$0xff]  ;;  %v88_v17 = vld [vmem:[#allocation5 + $0x38] sm:$0xff]  ;;  %v575_v18 = vpack.c.bf16 %v180_v13, %v179_v12  ;;  %v181_v19 = vld [vmem:[#allocation7 + $0x20] sm:$0xff] }
  0x4e   :  { %550 = vmatprep.subr.bf16.mxu0 %v757_v0  ;;  %v182_v20 = vld [vmem:[#allocation7 + $0x28] sm:$0xff]  ;;  %v557_v21 = vpack.c.bf16 %v88_v17, %v87_v16  ;;  %v89_v22 = vld [vmem:[#allocation5 + $0x40] sm:$0xff]  ;;  %v183_v25 = vld [vmem:[#allocation7 + $0x30] sm:$0xff] }
  0x4f   :  { %573 = vmatpush3.bf16.msra.mxu1 %v572_v15  ;;  %v90_v23 = vld [vmem:[#allocation5 + $0x48] sm:$0xff]  ;;  %v578_v24 = vpack.c.bf16 %v182_v20, %v181_v19  ;;  %v184_v26 = vld [vmem:[#allocation7 + $0x38] sm:$0xff]  ;;  %v91_v28 = vld [vmem:[#allocation5 + $0x50] sm:$0xff] }
  0x50   :  { %574 = vmatprep.subr.bf16.mxu1 %v757_v0  ;;  %v560_v27 = vpack.c.bf16 %v90_v23, %v89_v22  ;;  %v92_v29 = vld [vmem:[#allocation5 + $0x58] sm:$0xff]  ;;  %v581_v30 = vpack.c.bf16 %v184_v26, %v183_v25  ;;  %v185_v31 = vld [vmem:[#allocation7 + $0x40] sm:$0xff]  ;;  %v186_v32 = vld [vmem:[#allocation7 + $0x48] sm:$0xff] }
  0x51   :  { %552 = vmatpush3.bf16.msra.mxu0 %v551_v7  ;;  %v563_v33 = vpack.c.bf16 %v92_v29, %v91_v28  ;;  %v93_v34 = vld [vmem:[#allocation5 + $0x60] sm:$0xff]  ;;  %v94_v35 = vld [vmem:[#allocation5 + $0x68] sm:$0xff]  ;;  %v584_v36 = vpack.c.bf16 %v186_v32, %v185_v31  ;;  %v187_v37 = vld [vmem:[#allocation7 + $0x50] sm:$0xff] }
  0x52   :  { %553 = vmatprep.subr.bf16.mxu0 %v757_v0  ;;  %v188_v38 = vld [vmem:[#allocation7 + $0x58] sm:$0xff]  ;;  %v566_v39 = vpack.c.bf16 %v94_v35, %v93_v34  ;;  %v95_v40 = vld [vmem:[#allocation5 + $0x70] sm:$0xff]  ;;  %v189_v43 = vld [vmem:[#allocation7 + $0x60] sm:$0xff] }
  0x53   :  { %576 = vmatpush3.bf16.msra.mxu1 %v575_v18  ;;  %v96_v41 = vld [vmem:[#allocation5 + $0x78] sm:$0xff]  ;;  %v587_v42 = vpack.c.bf16 %v188_v38, %v187_v37  ;;  %v190_v44 = vld [vmem:[#allocation7 + $0x68] sm:$0xff]  ;;  %v191_v48 = vld [vmem:[#allocation7 + $0x70] sm:$0xff] }
  0x54   :  { %577 = vmatprep.subr.bf16.mxu1 %v757_v0  ;;  %v569_v45 = vpack.c.bf16 %v96_v41, %v95_v40  ;;  %v590_v46 = vpack.c.bf16 %v190_v44, %v189_v43  ;;  %v80_v47 = vld [vmem:[#allocation2] sm:$0xff]  ;;  %v276_v51 = vld [vmem:[#allocation8] sm:$0xff]  ;;  %v277_v52 = vld [vmem:[#allocation8 + $0x8] sm:$0xff] }
  0x55   :  { %555 = vmatpush3.bf16.msra.mxu0 %v554_v14  ;;  %v192_v49 = vld [vmem:[#allocation7 + $0x78] sm:$0xff]  ;;  %v596_v53 = vpack.c.bf16 %v277_v52, %v276_v51  ;;  %v278_v60 = vld [vmem:[#allocation8 + $0x10] sm:$0xff]  ;;  %v280_v63 = vld [vmem:[#allocation8 + $0x20] sm:$0xff] }
  0x56   :  { %556 = vmatprep.subr.bf16.mxu0 %v757_v0  ;;  %v593_v50 = vpack.c.bf16 %v192_v49, %v191_v48  ;;  %v387_v54 = vld [vmem:[%s911_s2] ss:$0 sm:$0xff]  ;;  %v282_v3 = vld [vmem:[#allocation8 + $0x30] sm:$0xff]  ;;  %v284_v6 = vld [vmem:[#allocation8 + $0x40] sm:$0xff] }
  0x57   :  { %579 = vmatpush3.bf16.msra.mxu1 %v578_v24  ;;  %v279_v61 = vld [vmem:[#allocation8 + $0x18] sm:$0xff]  ;;  %v285_v7 = vld [vmem:[#allocation8 + $0x48] sm:$0xff]  ;;  %v286_v9 = vld [vmem:[#allocation8 + $0x50] sm:$0xff] }
  0x58   :  { %580 = vmatprep.subr.bf16.mxu1 %v757_v0  ;;  %v599_v62 = vpack.c.bf16 %v279_v61, %v278_v60  ;;  %v283_v4 = vld [vmem:[#allocation8 + $0x38] sm:$0xff]  ;;  %v608_v8 = vpack.c.bf16 %v285_v7, %v284_v6  ;;  %v288_v12 = vld [vmem:[#allocation8 + $0x60] sm:$0xff]  ;;  %v289_v13 = vld [vmem:[#allocation8 + $0x68] sm:$0xff] }
  0x59   :  { %558 = vmatpush3.bf16.msra.mxu0 %v557_v21  ;;  %v605_v5 = vpack.c.bf16 %v283_v4, %v282_v3  ;;  %v287_v10 = vld [vmem:[#allocation8 + $0x58] sm:$0xff]  ;;  %v614_v14 = vpack.c.bf16 %v289_v13, %v288_v12  ;;  %v290_v15 = vld [vmem:[#allocation8 + $0x70] sm:$0xff] }
  0x5a   :  { %559 = vmatprep.subr.bf16.mxu0 %v757_v0  ;;  %v611_v11 = vpack.c.bf16 %v287_v10, %v286_v9  ;;  %v291_v16 = vld [vmem:[#allocation8 + $0x78] sm:$0xff] }
  0x5b   :  { %582 = vmatpush3.bf16.msra.mxu1 %v581_v30  ;;  %v617_v17 = vpack.c.bf16 %v291_v16, %v290_v15  ;;  %v388_v18 = vld [vmem:[%s913_s4] ss:$0 sm:$0xff]  ;;  %s721_s4 = scalar_lea.vmem %s377_s29, 128 }
  0x5c   :  { %583 = vmatprep.subr.bf16.mxu1 %v757_v0  ;;  %v390_v26 = vld [vmem:[%s915_s6] ss:$0 sm:$0xff]  ;;  %p722_p4 = scmp.ne.s32.totalorder %s377_s29, %s721_s4  ;;  %p727_p6 = scmp.lt.s32.totalorder %s721_s4, %s721_s4 }
  0x5d   :  { %561 = vmatpush3.bf16.msra.mxu0 %v560_v27 }
  0x5e   :  { %562 = vmatprep.subr.bf16.mxu0 %v757_v0  ;;  %p728_p7 = por %p727_p6, %p726_p5 }
  0x5f   :  { %585 = vmatpush3.bf16.msra.mxu1 %v584_v36 }
  0x60   :  { %586 = vmatprep.subr.bf16.mxu1 %v757_v0  ;;  %p729_p8 = pnand %p728_p7, %p722_p4 }
  0x61   :  { %564 = vmatpush3.bf16.msra.mxu0 %v563_v33 }
  0x62   :  { %565 = vmatprep.subr.bf16.mxu0 %v757_v0 }
  0x63   :  { %588 = vmatpush3.bf16.msra.mxu1 %v587_v42 }
  0x64   :  { %589 = vmatprep.subr.bf16.mxu1 %v757_v0 }
  0x65   :  { %567 = vmatpush3.bf16.msra.mxu0 %v566_v39 }
  0x66   :  { %568 = vmatprep.subr.bf16.mxu0 %v757_v0 }
  0x67   :  { %591 = vmatpush3.bf16.msra.mxu1 %v590_v46 }
  0x68   :  { %592 = vmatprep.subr.bf16.mxu1 %v757_v0 }
  0x69   :  { %570 = vmatpush3.bf16.msra.mxu0 %v569_v45 }
  0x6a   :  { %595 = vmatprep.subr.bf16.mxu0 %v757_v0 }
  0x6b   :  { %594 = vmatpush3.bf16.msra.mxu1 %v593_v50 }
  0x6c   :  { %475 = vmatmul.mubr.f32.vlgmr.msra.gmra.mrb[0].mxu0 %v80_v47 }
  0x6d   :  { %544 = vmatprep.mubr.msk.f32.mxu0 %vm758_vm0, %v759_v1  ;;  %597 = vmatpush3.bf16.msra.mxu0 %v596_v53  ;;  %v281_v1 = vld [vmem:[#allocation8 + $0x28] sm:$0xff] }
  0x6e   :  { %598 = vmatprep.subr.bf16.mxu0 %v757_v0  ;;  %v602_v2 = vpack.c.bf16 %v281_v1, %v280_v63 }
  0x71   :  { %600 = vmatpush3.bf16.msra.mxu0 %v599_v62 }
  0x72   :  { %601 = vmatprep.subr.bf16.mxu0 %v757_v0 }
  0x75   :  { %603 = vmatpush3.bf16.msra.mxu0 %v602_v2 }
  0x76   :  { %604 = vmatprep.subr.bf16.mxu0 %v757_v0 }
  0x79   :  { %606 = vmatpush3.bf16.msra.mxu0 %v605_v5 }
  0x7a   :  { %607 = vmatprep.subr.bf16.mxu0 %v757_v0 }
  0x7d   :  { %609 = vmatpush3.bf16.msra.mxu0 %v608_v8 }
  0x7e   :  { %610 = vmatprep.subr.bf16.mxu0 %v757_v0 }
  0x81   :  { %612 = vmatpush3.bf16.msra.mxu0 %v611_v11 }
  0x82   :  { %613 = vmatprep.subr.bf16.mxu0 %v757_v0 }
  0x85   :  { %615 = vmatpush3.bf16.msra.mxu0 %v614_v14 }
  0x86   :  { %616 = vmatprep.subr.bf16.mxu0 %v757_v0 }
  0x89   :  { %618 = vmatpush3.bf16.msra.mxu0 %v617_v17 }
 0x13f   :  { %v170_v55 = vpop.f32.mrb[0].mxu0 }
 0x140   :  { %v171_v56 = vadd.f32 %v387_v54, %v170_v55  ;;  %v476_v57 = vpop.f32.mrb[1].mxu0 }
 0x142   :  { %v175_v58 = vmul.f32 0.1, %v171_v56  ;;  %vm174_vm1 = vcmp.ge.f32.partialorder %v171_v56, 0.0 }
 0x144   :  { %v176_v59 = vsel %vm174_vm1, %v171_v56, %v175_v58 }
 0x145   :  { %510 = vmatmul.mubr.f32.vlgmr.msra.gmra.mrb[0].mxu1 %v176_v59 }
 0x218   :  { %v266_v19 = vpop.f32.mrb[0].mxu1 }
 0x219   :  { %v267_v20 = vadd.f32 %v388_v18, %v266_v19  ;;  %v511_v21 = vpop.f32.mrb[1].mxu1 }
 0x21b   :  { %v389_v22 = vmul.f32 -1.442695, %v267_v20 }
 0x21d   :  { %629 = vpow2.f32 %v389_v22 }
 0x227   :  { %v630_v23 = vpop.eup %629 }
 0x228   :  { %v273_v24 = vadd.f32 1.0, %v630_v23 }
 0x22a   :  { %631 = vrcp.f32 %v273_v24 }
 0x234   :  { %v632_v25 = vpop.eup %631 }
 0x235   :  { %545 = vmatmul.mubr.f32.vlgmr.msra.gmra.mrb[2].mxu0 %v632_v25 }
 0x308   :  { %v365_v0 = vpop.f32.mrb[2].mxu0 }
 0x309   :  { %v366_v27 = vadd.f32 %v390_v26, %v365_v0  ;;  %v546_v28 = vpop.f32.mrb[3].mxu0 }
 0x30b   :  { %369 = vst [vmem:[#allocation10] sm:$0xff] %v366_v27 }
 0x30c   :  { %732 = shalt.err (!%p729_p8)
}
 0x30d   :  { %s733_s9 = scalar_lea.hbm %s916_s7, 128 }
 0x30e   :  { %p734_p9 = scmp.ne.s32.totalorder %s916_s7, %s733_s9  ;;  %p737_p10 = scmp.lt.u32.totalorder %s733_s9, %s916_s7 }
 0x310   :  { %p739_p11 = pnand %p737_p10, %p734_p9 }
 0x312   :  { %742 = shalt.err (!%p739_p11)
}
 0x313   :  { %379 = dma.vmem_to_hbm [thread:$0]  %s377_s29, 128, %s916_s7, [#allocation4]  }
 0x314   :  { %749 = dma.done.wait [#allocation4], 128  }
 0x315   :  { %750 = vsyncadd [#allocation4], 4294967168 }
 0x316   :  { %383 = vsyncpa [#allocation3], 1 }
 0x317   :  { %384 = vsyncpa [#allocation6], 1 }
 0x318   :  { %385 = vsyncpa [#allocation9], 1 }
 0x319   :  { %386 = vsyncpa [#allocation4], 1 }

</bundles_post_ra>
